<compile_context>
chip_gen: v6e
topology: v6e:2x2x1
jax: 0.10.0
libtpu: 0.0.40
codegen_flags: <defaults>
</compile_context>

<pallas_src>
import functools

import jax
import jax.numpy as jnp
from jax.experimental import pallas as pl
from jax.experimental.pallas import tpu as pltpu


HIDDEN = 56  # fixed by the module definition


def _round_up(x, m):
    return (x + m - 1) // m * m


def _cdiv(a, b):
    return -(-a // b)


def _chip_gen():
    """Best-effort TPU generation from device_kind (0 = unknown/other)."""
    try:
        kind = jax.devices()[0].device_kind.lower().replace(" ", "")
    except Exception:
        return 0
    if "v7" in kind or "tpu7" in kind:
        return 7
    if "v6" in kind:
        return 6
    if "v5e" in kind or "v5lite" in kind:
        return 5
    return 0


def _vmem_budget(gen):
    """(vmem_limit_bytes for the compiler or None, byte budget for tiling)."""
    if gen == 7:
        return 48 << 20, 48 << 20      # v7x: 64 MiB physical per TC
    if gen == 6:
        return 96 << 20, 96 << 20      # v6e: 128 MiB physical
    if gen == 5:
        return 96 << 20, 96 << 20      # v5e: 128 MiB physical (16 MiB default)
    return None, 16 << 20              # unknown chip: keep compiler default


def _pick_tile_b(B, NP, HP, out_itemsize, gen, budget, tile_b):
    """Batch tile rows: multiple of 16, VMEM-budgeted, dual-TC aware."""
    if tile_b is not None:
        tb = max(16, _round_up(int(tile_b), 16))
        return min(tb, B)  # block rows == full batch is always legal
    # Resident weights/biases, conservatively counted as double-buffered bf16.
    weight_bytes = 2 * 2 * (NP * HP + HP * HP + HP * NP) + 2 * 4 * (2 * HP + NP)
    # Per batch-row VMEM: double-buffered f32 x tile + double-buffered output.
    per_row = 2 * NP * 4 + 2 * NP * out_itemsize
    avail = int(budget * 0.85) - weight_bytes
    # TODO(synk): for very large N (weights alone near the VMEM budget) add a
    # feature-dim grid axis (tile w1 rows / w3 cols with layer-1 accumulation).
    cap_rows = max(16, (avail // per_row) // 16 * 16) if avail > 16 * per_row else 16
    base = 1024 if gen == 6 else 512   # v6e: bigger tiles amortize step overhead
    tb = max(16, min(base, cap_rows, _round_up(B, 16)))
    # v7x has two TensorCores: ensure the "parallel" batch axis has >= 2 steps.
    if gen == 7 and B > 16 and _cdiv(B, tb) < 2:
        tb = max(16, min(tb, _round_up(_cdiv(B, 2), 16)))
    if tb > B:
        tb = B  # oversized block -> use the full (always legal) batch extent
    return tb


def _sampler_kernel(x_ref, w1_ref, b1_ref, w2_ref, b2_ref, w3_ref, b3_ref,
                    o_ref, *, bf16_act):
    # x arrives as f32; bf16 cast happens on the VPU, hidden under DMA/MXU.
    x = x_ref[...].astype(jnp.bfloat16)
    # Layer 1: bf16 [TB, NP] @ bf16 [NP, HP] -> f32 acc, +bias, tanh.
    a1 = jnp.dot(x, w1_ref[...], preferred_element_type=jnp.float32) + b1_ref[...]
    if bf16_act:   # v6e/v7x: bf16 VPU/EUP -> tanh in bf16 (no extra cast later)
        h1 = jnp.tanh(a1.astype(jnp.bfloat16))
    else:          # v5e: no bf16 VPU/EUP -> f32 tanh, cast after
        h1 = jnp.tanh(a1).astype(jnp.bfloat16)
    # Layer 2: bf16 [TB, HP] @ bf16 [HP, HP] -> f32 acc, +bias, tanh.
    a2 = jnp.dot(h1, w2_ref[...], preferred_element_type=jnp.float32) + b2_ref[...]
    if bf16_act:
        h2 = jnp.tanh(a2.astype(jnp.bfloat16))
    else:
        h2 = jnp.tanh(a2).astype(jnp.bfloat16)
    # Layer 3 (std=0.01 logits head): bf16 [TB, HP] @ bf16 [HP, NP] -> f32 acc.
    out = jnp.dot(h2, w3_ref[...], preferred_element_type=jnp.float32) + b3_ref[...]
    o_ref[...] = out.astype(o_ref.dtype)


@functools.partial(
    jax.jit,
    static_argnames=("tb", "bf16_act", "single_buffer_weights", "out_dtype",
                     "vmem_limit"),
)
def _forward_impl(xp, w1p, b1p, w2p, b2p, w3p, b3p, *, tb, bf16_act,
                  single_buffer_weights, out_dtype, vmem_limit):
    B, NP = xp.shape
    HP = w2p.shape[0]
    nb = _cdiv(B, tb)

    def const_spec(shape):
        # Grid-invariant weights/biases: single-buffer them when supported to
        # halve their resident VMEM footprint; otherwise default pipelining.
        if single_buffer_weights:
            return pl.BlockSpec(shape, lambda i: (0, 0),
                                pipeline_mode=pl.Buffered(1))
        return pl.BlockSpec(shape, lambda i: (0, 0))

    out_itemsize = jnp.dtype(out_dtype).itemsize
    cost = pl.CostEstimate(
        flops=int(2 * B * (NP * HP + HP * HP + HP * NP)),
        transcendentals=int(2 * B * HP),
        bytes_accessed=int(
            B * NP * 4                                   # x (f32 in)
            + (w1p.size + w2p.size + w3p.size) * 2       # bf16 weights
            + (b1p.size + b2p.size + b3p.size) * 4       # f32 biases
            + B * NP * out_itemsize                      # output
        ),
    )

    return pl.pallas_call(
        functools.partial(_sampler_kernel, bf16_act=bf16_act),
        out_shape=jax.ShapeDtypeStruct((B, NP), out_dtype),
        grid_spec=pltpu.PrefetchScalarGridSpec(
            num_scalar_prefetch=0,
            grid=(nb,),
            in_specs=[
                pl.BlockSpec((tb, NP), lambda i: (i, 0)),   # x tile (f32)
                const_spec((NP, HP)),                        # w1 (bf16, resident)
                const_spec((1, HP)),                         # b1 (f32)
                const_spec((HP, HP)),                        # w2
                const_spec((1, HP)),                         # b2
                const_spec((HP, NP)),                        # w3
                const_spec((1, NP)),                         # b3
            ],
            out_specs=pl.BlockSpec((tb, NP), lambda i: (i, 0)),
        ),
        compiler_params=pltpu.CompilerParams(
            dimension_semantics=("parallel",),
            vmem_limit_bytes=vmem_limit,
        ),
        cost_estimate=cost,
    )(xp, w1p, b1p, w2p, b2p, w3p, b3p)


_SINGLE_BUFFER_WEIGHTS_OK = None  # probed on the first forward call


def sampler_forward(x, padded_params, *, tile_b=None, out_dtype=jnp.float32):
    """x: [B, N] f32.  padded_params: output of pad_sampler_params()."""
    global _SINGLE_BUFFER_WEIGHTS_OK
    w1p, b1p, w2p, b2p, w3p, b3p = padded_params
    B, N = x.shape
    NP, HP = w1p.shape

    gen = _chip_gen()
    vmem_limit, budget = _vmem_budget(gen)
    out_itemsize = jnp.dtype(out_dtype).itemsize
    tb = _pick_tile_b(B, NP, HP, out_itemsize, gen, budget, tile_b)
    bf16_act = gen in (6, 7)

    # Only the lane (column) pad remains; the batch axis is tiled at its true
    # size and the partial last tile is masked by Pallas on store.
    xp = x if N == NP else jnp.pad(x, ((0, 0), (0, NP - N)))

    args = (xp, w1p, b1p, w2p, b2p, w3p, b3p)
    kwargs = dict(tb=tb, bf16_act=bf16_act, out_dtype=out_dtype,
                  vmem_limit=vmem_limit)
    if _SINGLE_BUFFER_WEIGHTS_OK is None:
        try:
            out = _forward_impl(*args, single_buffer_weights=True, **kwargs)
            _SINGLE_BUFFER_WEIGHTS_OK = True
        except Exception:
            # pipeline_mode=pl.Buffered(1) unsupported on this build: fall back.
            _SINGLE_BUFFER_WEIGHTS_OK = False
            out = _forward_impl(*args, single_buffer_weights=False, **kwargs)
    else:
        out = _forward_impl(*args,
                            single_buffer_weights=_SINGLE_BUFFER_WEIGHTS_OK,
                            **kwargs)
    return out if N == NP else out[:, :N]


def init_sampler_params(key, n):
    """Orthogonal init mirroring layer_init(std=sqrt(2)) / std=0.01 head."""
    k1, k2, k3 = jax.random.split(key, 3)
    orth = jax.nn.initializers.orthogonal
    sqrt2 = float(jnp.sqrt(2.0))
    # Stored as [in, out] (kernel computes x @ W + b).
    w1 = orth(scale=sqrt2)(k1, (n, HIDDEN), jnp.float32)
    w2 = orth(scale=sqrt2)(k2, (HIDDEN, HIDDEN), jnp.float32)
    w3 = orth(scale=0.01)(k3, (HIDDEN, n), jnp.float32)
    b1 = jnp.zeros((1, HIDDEN), jnp.float32)
    b2 = jnp.zeros((1, HIDDEN), jnp.float32)
    b3 = jnp.zeros((1, n), jnp.float32)
    return w1, b1, w2, b2, w3, b3


def pad_sampler_params(params):
    """One-time lane-dense pad + bf16 cast of weights (biases stay f32)."""
    w1, b1, w2, b2, w3, b3 = params
    N, H = w1.shape
    HP = _round_up(H, 128)
    NP = _round_up(N, 128)
    w1p = jnp.pad(w1, ((0, NP - N), (0, HP - H))).astype(jnp.bfloat16)
    w2p = jnp.pad(w2, ((0, HP - H), (0, HP - H))).astype(jnp.bfloat16)
    w3p = jnp.pad(w3, ((0, HP - H), (0, NP - N))).astype(jnp.bfloat16)
    b1p = jnp.pad(b1, ((0, 0), (0, HP - H)))
    b2p = jnp.pad(b2, ((0, 0), (0, HP - H)))
    b3p = jnp.pad(b3, ((0, 0), (0, NP - N)))
    return (w1p, b1p, w2p, b2p, w3p, b3p)


def reference_forward(x, w1, b1, w2, b2, w3, b3):
    h1 = jnp.tanh(x @ w1 + b1)
    h2 = jnp.tanh(h1 @ w2 + b2)
    return h2 @ w3 + b3


if __name__ == "__main__":
    key = jax.random.PRNGKey(0)
    k_param, k_x = jax.random.split(key)

    B, N = 8, 32  # N = action-dim of the Sampler head
    params = init_sampler_params(k_param, N)
    padded = pad_sampler_params(params)   # padded + bf16-cast once

    x = jax.random.normal(k_x, (B, N), dtype=jnp.float32)
    out = jax.block_until_ready(sampler_forward(x, padded))
    ref = reference_forward(x, *params)
    assert out.shape == (B, N)
    assert out.dtype == jnp.float32
    # Loose tolerance: MXU operands are bf16 (f32 accumulation).
    assert jnp.allclose(out, ref, atol=2e-2, rtol=2e-2), "mismatch vs reference"

    # Multi-step grid with a partial (masked) last tile: B=36, TB=16 -> 3 steps.
    B2 = 36
    x2 = jax.random.normal(jax.random.PRNGKey(1), (B2, N), dtype=jnp.float32)
    out2 = jax.block_until_ready(sampler_forward(x2, padded, tile_b=8))
    ref2 = reference_forward(x2, *params)
    assert out2.shape == (B2, N)
    assert jnp.allclose(out2, ref2, atol=2e-2, rtol=2e-2), \
        "mismatch vs reference (tiled/partial)"

    print("KERNEL_OK")
</pallas_src>

<mosaic_0001>
module attributes {stable_mosaic.version = 11 : i64} {
  func.func @_sampler_kernel(%arg0: i32, %arg1: memref<8x128xf32, #tpu.memory_space<vmem>>, %arg2: memref<128x128xbf16, #tpu.memory_space<vmem>>, %arg3: memref<1x128xf32, #tpu.memory_space<vmem>>, %arg4: memref<128x128xbf16, #tpu.memory_space<vmem>>, %arg5: memref<1x128xf32, #tpu.memory_space<vmem>>, %arg6: memref<128x128xbf16, #tpu.memory_space<vmem>>, %arg7: memref<1x128xf32, #tpu.memory_space<vmem>>, %arg8: memref<8x128xf32, #tpu.memory_space<vmem>>) attributes {dimension_semantics = [#tpu.dimension_semantics<parallel>], iteration_bounds = array<i64: 1>, scalar_prefetch = 0 : i64, scratch_operands = 0 : i64, tpu.core_type = #tpu.core_type<tc>, window_params = [{transform_indices = @transform_0, window_bounds = array<i64: 8, 128>}, {pipeline_mode = #tpu.pipeline_mode<synchronous>, transform_indices = @transform_1, window_bounds = array<i64: 128, 128>}, {pipeline_mode = #tpu.pipeline_mode<synchronous>, transform_indices = @transform_2, window_bounds = array<i64: 1, 128>}, {pipeline_mode = #tpu.pipeline_mode<synchronous>, transform_indices = @transform_3, window_bounds = array<i64: 128, 128>}, {pipeline_mode = #tpu.pipeline_mode<synchronous>, transform_indices = @transform_4, window_bounds = array<i64: 1, 128>}, {pipeline_mode = #tpu.pipeline_mode<synchronous>, transform_indices = @transform_5, window_bounds = array<i64: 128, 128>}, {pipeline_mode = #tpu.pipeline_mode<synchronous>, transform_indices = @transform_6, window_bounds = array<i64: 1, 128>}, {transform_indices = @transform_7, window_bounds = array<i64: 8, 128>}]} {
    %c0 = arith.constant 0 : index
    %c0_0 = arith.constant 0 : index
    %0 = vector.load %arg1[%c0, %c0_0] : memref<8x128xf32, #tpu.memory_space<vmem>>, vector<8x128xf32>
    %1 = arith.truncf %0 : vector<8x128xf32> to vector<8x128xbf16>
    %c0_1 = arith.constant 0 : index
    %c0_2 = arith.constant 0 : index
    %2 = vector.load %arg2[%c0_1, %c0_2] : memref<128x128xbf16, #tpu.memory_space<vmem>>, vector<128x128xbf16>
    %cst = arith.constant dense<0.000000e+00> : vector<8x128xf32>
    %3 = tpu.matmul %1, %2, %cst {dimension_numbers = #tpu.dot_dimension_numbers<[1], [0], [0], [1], [0, 0, 1, 1], [], []>} : vector<8x128xbf16>, vector<128x128xbf16>, vector<8x128xf32> -> vector<8x128xf32>
    %c0_3 = arith.constant 0 : index
    %c0_4 = arith.constant 0 : index
    %4 = vector.load %arg3[%c0_3, %c0_4] : memref<1x128xf32, #tpu.memory_space<vmem>>, vector<1x128xf32>
    %5 = vector.broadcast %4 : vector<1x128xf32> to vector<8x128xf32>
    %6 = arith.addf %3, %5 : vector<8x128xf32>
    %7 = math.tanh %6 : vector<8x128xf32>
    %8 = arith.truncf %7 : vector<8x128xf32> to vector<8x128xbf16>
    %c0_5 = arith.constant 0 : index
    %c0_6 = arith.constant 0 : index
    %9 = vector.load %arg4[%c0_5, %c0_6] : memref<128x128xbf16, #tpu.memory_space<vmem>>, vector<128x128xbf16>
    %cst_7 = arith.constant dense<0.000000e+00> : vector<8x128xf32>
    %10 = tpu.matmul %8, %9, %cst_7 {dimension_numbers = #tpu.dot_dimension_numbers<[1], [0], [0], [1], [0, 0, 1, 1], [], []>} : vector<8x128xbf16>, vector<128x128xbf16>, vector<8x128xf32> -> vector<8x128xf32>
    %c0_8 = arith.constant 0 : index
    %c0_9 = arith.constant 0 : index
    %11 = vector.load %arg5[%c0_8, %c0_9] : memref<1x128xf32, #tpu.memory_space<vmem>>, vector<1x128xf32>
    %12 = vector.broadcast %11 : vector<1x128xf32> to vector<8x128xf32>
    %13 = arith.addf %10, %12 : vector<8x128xf32>
    %14 = math.tanh %13 : vector<8x128xf32>
    %15 = arith.truncf %14 : vector<8x128xf32> to vector<8x128xbf16>
    %c0_10 = arith.constant 0 : index
    %c0_11 = arith.constant 0 : index
    %16 = vector.load %arg6[%c0_10, %c0_11] : memref<128x128xbf16, #tpu.memory_space<vmem>>, vector<128x128xbf16>
    %cst_12 = arith.constant dense<0.000000e+00> : vector<8x128xf32>
    %17 = tpu.matmul %15, %16, %cst_12 {dimension_numbers = #tpu.dot_dimension_numbers<[1], [0], [0], [1], [0, 0, 1, 1], [], []>} : vector<8x128xbf16>, vector<128x128xbf16>, vector<8x128xf32> -> vector<8x128xf32>
    %c0_13 = arith.constant 0 : index
    %c0_14 = arith.constant 0 : index
    %18 = vector.load %arg7[%c0_13, %c0_14] : memref<1x128xf32, #tpu.memory_space<vmem>>, vector<1x128xf32>
    %19 = vector.broadcast %18 : vector<1x128xf32> to vector<8x128xf32>
    %20 = arith.addf %17, %19 : vector<8x128xf32>
    %c0_15 = arith.constant 0 : index
    %c0_16 = arith.constant 0 : index
    %21 = vector.load %arg8[%c0_15, %c0_16] : memref<8x128xf32, #tpu.memory_space<vmem>>, vector<8x128xf32>
    tpu.vector_store %arg8[%c0_15, %c0_16], %20 {strides = array<i32>} : memref<8x128xf32, #tpu.memory_space<vmem>>, vector<8x128xf32>,
    return
  }
  func.func @transform_0(%arg0: i32) -> (i32, i32) {
    %c0_i32 = arith.constant 0 : i32
    %c0_i32_0 = arith.constant 0 : i32
    return %arg0, %c0_i32 : i32, i32
  }
  func.func @transform_1(%arg0: i32) -> (i32, i32) {
    %c0_i32 = arith.constant 0 : i32
    %c0_i32_0 = arith.constant 0 : i32
    %c0_i32_1 = arith.constant 0 : i32
    return %c0_i32, %c0_i32_0 : i32, i32
  }
  func.func @transform_2(%arg0: i32) -> (i32, i32) {
    %c0_i32 = arith.constant 0 : i32
    %c0_i32_0 = arith.constant 0 : i32
    %c0_i32_1 = arith.constant 0 : i32
    return %c0_i32, %c0_i32_0 : i32, i32
  }
  func.func @transform_3(%arg0: i32) -> (i32, i32) {
    %c0_i32 = arith.constant 0 : i32
    %c0_i32_0 = arith.constant 0 : i32
    %c0_i32_1 = arith.constant 0 : i32
    return %c0_i32, %c0_i32_0 : i32, i32
  }
  func.func @transform_4(%arg0: i32) -> (i32, i32) {
    %c0_i32 = arith.constant 0 : i32
    %c0_i32_0 = arith.constant 0 : i32
    %c0_i32_1 = arith.constant 0 : i32
    return %c0_i32, %c0_i32_0 : i32, i32
  }
  func.func @transform_5(%arg0: i32) -> (i32, i32) {
    %c0_i32 = arith.constant 0 : i32
    %c0_i32_0 = arith.constant 0 : i32
    %c0_i32_1 = arith.constant 0 : i32
    return %c0_i32, %c0_i32_0 : i32, i32
  }
  func.func @transform_6(%arg0: i32) -> (i32, i32) {
    %c0_i32 = arith.constant 0 : i32
    %c0_i32_0 = arith.constant 0 : i32
    %c0_i32_1 = arith.constant 0 : i32
    return %c0_i32, %c0_i32_0 : i32, i32
  }
  func.func @transform_7(%arg0: i32) -> (i32, i32) {
    %c0_i32 = arith.constant 0 : i32
    %c0_i32_0 = arith.constant 0 : i32
    return %arg0, %c0_i32 : i32, i32
  }
}

module attributes {stable_mosaic.version = 11 : i64} {
  func.func @_sampler_kernel(%arg0: i32, %arg1: memref<8x128xf32, #tpu.memory_space<vmem>>, %arg2: memref<128x128xbf16, #tpu.memory_space<vmem>>, %arg3: memref<1x128xf32, #tpu.memory_space<vmem>>, %arg4: memref<128x128xbf16, #tpu.memory_space<vmem>>, %arg5: memref<1x128xf32, #tpu.memory_space<vmem>>, %arg6: memref<128x128xbf16, #tpu.memory_space<vmem>>, %arg7: memref<1x128xf32, #tpu.memory_space<vmem>>, %arg8: memref<8x128xf32, #tpu.memory_space<vmem>>) attributes {dimension_semantics = [#tpu.dimension_semantics<parallel>], iteration_bounds = array<i64: 1>, scalar_prefetch = 0 : i64, scratch_operands = 0 : i64, tpu.core_type = #tpu.core_type<tc>, window_params = [{transform_indices = @transform_0, window_bounds = array<i64: 8, 128>}, {pipeline_mode = #tpu.pipeline_mode<synchronous>, transform_indices = @transform_1, window_bounds = array<i64: 128, 128>}, {pipeline_mode = #tpu.pipeline_mode<synchronous>, transform_indices = @transform_2, window_bounds = array<i64: 1, 128>}, {pipeline_mode = #tpu.pipeline_mode<synchronous>, transform_indices = @transform_3, window_bounds = array<i64: 128, 128>}, {pipeline_mode = #tpu.pipeline_mode<synchronous>, transform_indices = @transform_4, window_bounds = array<i64: 1, 128>}, {pipeline_mode = #tpu.pipeline_mode<synchronous>, transform_indices = @transform_5, window_bounds = array<i64: 128, 128>}, {pipeline_mode = #tpu.pipeline_mode<synchronous>, transform_indices = @transform_6, window_bounds = array<i64: 1, 128>}, {transform_indices = @transform_7, window_bounds = array<i64: 8, 128>}]} {
    %c0 = arith.constant 0 : index
    %c0_0 = arith.constant 0 : index
    %0 = vector.load %arg1[%c0, %c0_0] : memref<8x128xf32, #tpu.memory_space<vmem>>, vector<8x128xf32>
    %1 = arith.truncf %0 : vector<8x128xf32> to vector<8x128xbf16>
    %c0_1 = arith.constant 0 : index
    %c0_2 = arith.constant 0 : index
    %2 = vector.load %arg2[%c0_1, %c0_2] : memref<128x128xbf16, #tpu.memory_space<vmem>>, vector<128x128xbf16>
    %cst = arith.constant dense<0.000000e+00> : vector<8x128xf32>
    %3 = tpu.matmul %1, %2, %cst {dimension_numbers = #tpu.dot_dimension_numbers<[1], [0], [0], [1], [0, 0, 1, 1], [], []>} : vector<8x128xbf16>, vector<128x128xbf16>, vector<8x128xf32> -> vector<8x128xf32>
    %c0_3 = arith.constant 0 : index
    %c0_4 = arith.constant 0 : index
    %4 = vector.load %arg3[%c0_3, %c0_4] : memref<1x128xf32, #tpu.memory_space<vmem>>, vector<1x128xf32>
    %5 = vector.broadcast %4 : vector<1x128xf32> to vector<8x128xf32>
    %6 = arith.addf %3, %5 : vector<8x128xf32>
    %7 = math.tanh %6 : vector<8x128xf32>
    %8 = arith.truncf %7 : vector<8x128xf32> to vector<8x128xbf16>
    %c0_5 = arith.constant 0 : index
    %c0_6 = arith.constant 0 : index
    %9 = vector.load %arg4[%c0_5, %c0_6] : memref<128x128xbf16, #tpu.memory_space<vmem>>, vector<128x128xbf16>
    %cst_7 = arith.constant dense<0.000000e+00> : vector<8x128xf32>
    %10 = tpu.matmul %8, %9, %cst_7 {dimension_numbers = #tpu.dot_dimension_numbers<[1], [0], [0], [1], [0, 0, 1, 1], [], []>} : vector<8x128xbf16>, vector<128x128xbf16>, vector<8x128xf32> -> vector<8x128xf32>
    %c0_8 = arith.constant 0 : index
    %c0_9 = arith.constant 0 : index
    %11 = vector.load %arg5[%c0_8, %c0_9] : memref<1x128xf32, #tpu.memory_space<vmem>>, vector<1x128xf32>
    %12 = vector.broadcast %11 : vector<1x128xf32> to vector<8x128xf32>
    %13 = arith.addf %10, %12 : vector<8x128xf32>
    %14 = math.tanh %13 : vector<8x128xf32>
    %15 = arith.truncf %14 : vector<8x128xf32> to vector<8x128xbf16>
    %c0_10 = arith.constant 0 : index
    %c0_11 = arith.constant 0 : index
    %16 = vector.load %arg6[%c0_10, %c0_11] : memref<128x128xbf16, #tpu.memory_space<vmem>>, vector<128x128xbf16>
    %cst_12 = arith.constant dense<0.000000e+00> : vector<8x128xf32>
    %17 = tpu.matmul %15, %16, %cst_12 {dimension_numbers = #tpu.dot_dimension_numbers<[1], [0], [0], [1], [0, 0, 1, 1], [], []>} : vector<8x128xbf16>, vector<128x128xbf16>, vector<8x128xf32> -> vector<8x128xf32>
    %c0_13 = arith.constant 0 : index
    %c0_14 = arith.constant 0 : index
    %18 = vector.load %arg7[%c0_13, %c0_14] : memref<1x128xf32, #tpu.memory_space<vmem>>, vector<1x128xf32>
    %19 = vector.broadcast %18 : vector<1x128xf32> to vector<8x128xf32>
    %20 = arith.addf %17, %19 : vector<8x128xf32>
    %c0_15 = arith.constant 0 : index
    %c0_16 = arith.constant 0 : index
    %21 = vector.load %arg8[%c0_15, %c0_16] : memref<8x128xf32, #tpu.memory_space<vmem>>, vector<8x128xf32>
    tpu.vector_store %arg8[%c0_15, %c0_16], %20 {strides = array<i32>} : memref<8x128xf32, #tpu.memory_space<vmem>>, vector<8x128xf32>,
    return
  }
  func.func @transform_0(%arg0: i32) -> (i32, i32) {
    %c0_i32 = arith.constant 0 : i32
    %c0_i32_0 = arith.constant 0 : i32
    return %arg0, %c0_i32 : i32, i32
  }
  func.func @transform_1(%arg0: i32) -> (i32, i32) {
    %c0_i32 = arith.constant 0 : i32
    %c0_i32_0 = arith.constant 0 : i32
    %c0_i32_1 = arith.constant 0 : i32
    return %c0_i32, %c0_i32_0 : i32, i32
  }
  func.func @transform_2(%arg0: i32) -> (i32, i32) {
    %c0_i32 = arith.constant 0 : i32
    %c0_i32_0 = arith.constant 0 : i32
    %c0_i32_1 = arith.constant 0 : i32
    return %c0_i32, %c0_i32_0 : i32, i32
  }
  func.func @transform_3(%arg0: i32) -> (i32, i32) {
    %c0_i32 = arith.constant 0 : i32
    %c0_i32_0 = arith.constant 0 : i32
    %c0_i32_1 = arith.constant 0 : i32
    return %c0_i32, %c0_i32_0 : i32, i32
  }
  func.func @transform_4(%arg0: i32) -> (i32, i32) {
    %c0_i32 = arith.constant 0 : i32
    %c0_i32_0 = arith.constant 0 : i32
    %c0_i32_1 = arith.constant 0 : i32
    return %c0_i32, %c0_i32_0 : i32, i32
  }
  func.func @transform_5(%arg0: i32) -> (i32, i32) {
    %c0_i32 = arith.constant 0 : i32
    %c0_i32_0 = arith.constant 0 : i32
    %c0_i32_1 = arith.constant 0 : i32
    return %c0_i32, %c0_i32_0 : i32, i32
  }
  func.func @transform_6(%arg0: i32) -> (i32, i32) {
    %c0_i32 = arith.constant 0 : i32
    %c0_i32_0 = arith.constant 0 : i32
    %c0_i32_1 = arith.constant 0 : i32
    return %c0_i32, %c0_i32_0 : i32, i32
  }
  func.func @transform_7(%arg0: i32) -> (i32, i32) {
    %c0_i32 = arith.constant 0 : i32
    %c0_i32_0 = arith.constant 0 : i32
    return %arg0, %c0_i32 : i32, i32
  }
}

</mosaic_0001>

<bundles_post_ra>
// kernel: _forward_impl.1
= control target key start
LH: loop header
LB: loop body
LE: loop exit
PB: predicated region body
PF: predicated region fallthrough
CT: control target
= control target key end

     0   :  { %12 = vsyncpa [#allocation3], 0  ;;  %s809_s0 = inlined_call_operand.hbm [shape: f32[8,128], index: 0, kind: input, shape index: {}]   ;;  %s810_s1 = inlined_call_operand.hbm [shape: bf16[128,128], index: 1, kind: input, shape index: {}]   ;;  %s811_s2 = inlined_call_operand.vmem [shape: f32[1,128], index: 2, kind: input, shape index: {}]   ;;  %s812_s3 = inlined_call_operand.hbm [shape: bf16[128,128], index: 3, kind: input, shape index: {}]   ;;  %s813_s4 = inlined_call_operand.vmem [shape: f32[1,128], index: 4, kind: input, shape index: {}]   ;;  %s814_s5 = inlined_call_operand.hbm [shape: bf16[128,128], index: 5, kind: input, shape index: {}]   ;;  %s815_s6 = inlined_call_operand.vmem [shape: f32[1,128], index: 6, kind: input, shape index: {}]   ;;  %s816_s7 = inlined_call_operand.hbm [shape: f32[8,128], index: 7, kind: output, shape index: {}]  }
   0x1   :  { %13 = vsyncpa [#allocation6], 0 }
   0x2   :  { %14 = vsyncpa [#allocation9], 0 }
   0x3   :  { %15 = vsyncpa [#allocation4], 0  ;;  %s697_s24 = smov [#allocation5]  }
   0x4   :  { %s31_s25 = sshll.u32 %s697_s24, 4  ;;  %s32_s25 = int_to_ptr.vmem [resolvable:$true] %s31_s25 }
   0x5   :  { %s597_s26 = scalar_lea.vmem %s32_s25, 1024  ;;  %p602_p1 = scmp.lt.s32.totalorder %s32_s25, %s32_s25 }
   0x6   :  { %p598_p0 = scmp.ne.s32.totalorder %s32_s25, %s597_s26  ;;  %p603_p2 = scmp.lt.s32.totalorder %s597_s26, %s597_s26 }
   0x8   :  { %p604_p3 = por %p603_p2, %p602_p1 }
   0xa   :  { %p605_p4 = pnand %p604_p3, %p598_p0 }
   0xc   :  { %608 = shalt.err (!%p605_p4)
}
   0xd   :  { %s698_s27 = smov 64   ;;  %s699_s28 = smov 4  }
   0xe   :  { %37 = dma.hbm_to_vmem [thread:$0]  %s810_s1, 1024, %s32_s25, [#allocation6], %s698_s27, %s698_s27, %s699_s28  }
   0xf   :  { %s700_s8 = smov [#allocation2]   ;;  %s701_s10 = smov [#allocation7]  }
  0x10   :  { %s22_s9 = sshll.u32 %s700_s8, 4  ;;  %s45_s11 = sshll.u32 %s701_s10, 4  ;;  %s23_s9 = int_to_ptr.vmem [resolvable:$true] %s22_s9  ;;  %s46_s11 = int_to_ptr.vmem [resolvable:$true] %s45_s11 }
  0x11   :  { %s617_s12 = scalar_lea.vmem %s23_s9, 128  ;;  %p622_p6 = scmp.lt.s32.totalorder %s23_s9, %s23_s9 }
  0x12   :  { %p618_p5 = scmp.ne.s32.totalorder %s23_s9, %s617_s12  ;;  %p623_p7 = scmp.lt.s32.totalorder %s617_s12, %s617_s12 }
  0x14   :  { %p624_p8 = por %p623_p7, %p622_p6 }
  0x16   :  { %p625_p9 = pnand %p624_p8, %p618_p5 }
  0x18   :  { %628 = shalt.err (!%p625_p9)
}
  0x19   :  { %25 = dma.hbm_to_vmem [thread:$0]  %s809_s0, 128, %s23_s9, [#allocation3]  }
  0x1a   :  { %s637_s15 = scalar_lea.vmem %s46_s11, 1024  ;;  %p642_p11 = scmp.lt.s32.totalorder %s46_s11, %s46_s11 }
  0x1b   :  { %p638_p10 = scmp.ne.s32.totalorder %s46_s11, %s637_s15  ;;  %p643_p12 = scmp.lt.s32.totalorder %s637_s15, %s637_s15 }
  0x1d   :  { %p644_p13 = por %p643_p12, %p642_p11 }
  0x1f   :  { %p645_p0 = pnand %p644_p13, %p638_p10 }
  0x21   :  { %648 = shalt.err (!%p645_p0)
}
  0x22   :  { %51 = dma.hbm_to_vmem [thread:$0]  %s812_s3, 1024, %s46_s11, [#allocation6], %s698_s27, %s698_s27, %s699_s28  }
  0x23   :  { %s702_s17 = smov [#allocation8]  }
  0x24   :  { %s59_s18 = sshll.u32 %s702_s17, 4  ;;  %s60_s18 = int_to_ptr.vmem [resolvable:$true] %s59_s18 }
  0x25   :  { %s657_s19 = scalar_lea.vmem %s60_s18, 1024  ;;  %p662_p2 = scmp.lt.s32.totalorder %s60_s18, %s60_s18 }
  0x26   :  { %p658_p1 = scmp.ne.s32.totalorder %s60_s18, %s657_s19  ;;  %p663_p3 = scmp.lt.s32.totalorder %s657_s19, %s657_s19 }
  0x28   :  { %p664_p4 = por %p663_p3, %p662_p2 }
  0x2a   :  { %p665_p5 = pnand %p664_p4, %p658_p1 }
  0x2c   :  { %668 = shalt.err (!%p665_p5)
}
  0x2d   :  { %65 = dma.hbm_to_vmem [thread:$0]  %s814_s5, 1024, %s60_s18, [#allocation9], %s698_s27, %s698_s27, %s699_s28  }
  0x2e   :  { %689 = dma.done.wait [#allocation3], 128  }
  0x2f   :  { %690 = vsyncadd [#allocation3], 4294967168 }
  0x30   :  { %691 = dma.done.wait [#allocation6], 2048  }
  0x31   :  { %692 = vsyncadd [#allocation6], 4294965248 }
  0x32   :  { %693 = dma.done.wait [#allocation9], 1024  }
  0x33   :  { %694 = vsyncadd [#allocation9], 4294966272  ;;  %v703_v0 = vmov 0.0   ;;  %vm704_vm0 = vmmov 0   ;;  %v561_v1 = vld [vmem:[#allocation5 + $0x38] sm:$0xff]   ;;  %v562_v2 = vld [vmem:[#allocation5 + $0x30] sm:$0xff]  }
  0x34   :  { %492 = vmatprep.subr.bf16.mxu0 %v703_v0  ;;  %508 = vmatprep.mubr.msk.bf16.mxu0 %vm704_vm0, %v703_v0  ;;  %v563_v3 = vld [vmem:[#allocation5 + $0x28] sm:$0xff]   ;;  %v569_v4 = vld [vmem:[#allocation7 + $0x38] sm:$0xff]   ;;  %v564_v5 = vld [vmem:[#allocation5 + $0x20] sm:$0xff]   ;;  %s705_s24 = smov [#allocation10]  }
  0x35   :  { %512 = vmatprep.subr.bf16.mxu1 %v703_v0  ;;  %528 = vmatprep.mubr.msk.bf16.mxu1 %vm704_vm0, %v703_v0  ;;  %v570_v6 = vld [vmem:[#allocation7 + $0x30] sm:$0xff]   ;;  %v565_v7 = vld [vmem:[#allocation5 + $0x18] sm:$0xff]   ;;  %v571_v8 = vld [vmem:[#allocation7 + $0x28] sm:$0xff]   ;;  %s427_s25 = sshll.u32 %s705_s24, 4  ;;  %s428_s25 = int_to_ptr.vmem [resolvable:$true] %s427_s25 }
  0x36   :  { %493 = vmatpush3.bf16.msra.mxu0 %v561_v1  ;;  %513 = vmatpush3.bf16.msra.mxu1 %v569_v4  ;;  %v566_v9 = vld [vmem:[#allocation5 + $0x10] sm:$0xff]   ;;  %v567_v10 = vld [vmem:[#allocation5 + $0x8] sm:$0xff]   ;;  %v568_v11 = vld [vmem:[#allocation5] sm:$0xff]   ;;  %p674_p7 = scmp.lt.s32.totalorder %s428_s25, %s428_s25 }
  0x37   :  { %494 = vmatprep.subr.bf16.mxu0 %v703_v0  ;;  %514 = vmatprep.subr.bf16.mxu1 %v703_v0  ;;  %v81_v12 = vld [vmem:[#allocation2] sm:$0xff]  ;;  %v572_v14 = vld [vmem:[#allocation7 + $0x20] sm:$0xff]   ;;  %v574_v16 = vld [vmem:[#allocation7 + $0x10] sm:$0xff]  }
  0x38   :  { %v82_v13 = vpack.c.bf16 %v81_v12, %v81_v12  ;;  %v573_v15 = vld [vmem:[#allocation7 + $0x18] sm:$0xff]   ;;  %v575_v17 = vld [vmem:[#allocation7 + $0x8] sm:$0xff]   ;;  %v576_v18 = vld [vmem:[#allocation7] sm:$0xff]  }
  0x39   :  { %v577_v19 = vld [vmem:[#allocation8 + $0x38] sm:$0xff]   ;;  %v578_v20 = vld [vmem:[#allocation8 + $0x30] sm:$0xff]   ;;  %v579_v21 = vld [vmem:[#allocation8 + $0x28] sm:$0xff]  }
  0x3a   :  { %495 = vmatpush3.bf16.msra.mxu0 %v562_v2  ;;  %515 = vmatpush3.bf16.msra.mxu1 %v570_v6  ;;  %v438_v22 = vld [vmem:[%s811_s2] ss:$0 sm:$0xff]  ;;  %v580_v30 = vld [vmem:[#allocation8 + $0x20] sm:$0xff]   ;;  %v582_v32 = vld [vmem:[#allocation8 + $0x10] sm:$0xff]  }
  0x3b   :  { %496 = vmatprep.subr.bf16.mxu0 %v703_v0  ;;  %516 = vmatprep.subr.bf16.mxu1 %v703_v0  ;;  %v581_v31 = vld [vmem:[#allocation8 + $0x18] sm:$0xff]   ;;  %v583_v33 = vld [vmem:[#allocation8 + $0x8] sm:$0xff]   ;;  %v584_v34 = vld [vmem:[#allocation8] sm:$0xff]  }
  0x3c   :  { %v447_v35 = vld [vmem:[%s813_s4] ss:$0 sm:$0xff]  ;;  %s669_s4 = scalar_lea.vmem %s428_s25, 128 }
  0x3d   :  { %v456_v43 = vld [vmem:[%s815_s6] ss:$0 sm:$0xff]  ;;  %p670_p6 = scmp.ne.s32.totalorder %s428_s25, %s669_s4  ;;  %p675_p8 = scmp.lt.s32.totalorder %s669_s4, %s669_s4 }
  0x3e   :  { %497 = vmatpush3.bf16.msra.mxu0 %v563_v3  ;;  %517 = vmatpush3.bf16.msra.mxu1 %v571_v8 }
  0x3f   :  { %498 = vmatprep.subr.bf16.mxu0 %v703_v0  ;;  %518 = vmatprep.subr.bf16.mxu1 %v703_v0  ;;  %p676_p9 = por %p675_p8, %p674_p7 }
  0x41   :  { %p677_p10 = pnand %p676_p9, %p670_p6 }
  0x42   :  { %499 = vmatpush3.bf16.msra.mxu0 %v564_v5  ;;  %519 = vmatpush3.bf16.msra.mxu1 %v572_v14 }
  0x43   :  { %500 = vmatprep.subr.bf16.mxu0 %v703_v0  ;;  %520 = vmatprep.subr.bf16.mxu1 %v703_v0 }
  0x46   :  { %501 = vmatpush3.bf16.msra.mxu0 %v565_v7  ;;  %521 = vmatpush3.bf16.msra.mxu1 %v573_v15 }
  0x47   :  { %502 = vmatprep.subr.bf16.mxu0 %v703_v0  ;;  %522 = vmatprep.subr.bf16.mxu1 %v703_v0 }
  0x4a   :  { %503 = vmatpush3.bf16.msra.mxu0 %v566_v9  ;;  %523 = vmatpush3.bf16.msra.mxu1 %v574_v16 }
  0x4b   :  { %504 = vmatprep.subr.bf16.mxu0 %v703_v0  ;;  %524 = vmatprep.subr.bf16.mxu1 %v703_v0 }
  0x4e   :  { %505 = vmatpush3.bf16.msra.mxu0 %v567_v10  ;;  %525 = vmatpush3.bf16.msra.mxu1 %v575_v17 }
  0x4f   :  { %506 = vmatprep.subr.bf16.mxu0 %v703_v0  ;;  %526 = vmatprep.subr.bf16.mxu1 %v703_v0 }
  0x52   :  { %507 = vmatpush3.bf16.msra.mxu0 %v568_v11  ;;  %527 = vmatpush3.bf16.msra.mxu1 %v576_v18 }
  0x53   :  { %532 = vmatprep.subr.bf16.mxu0 %v703_v0 }
  0x55   :  { %509 = vmatmul.mubr.bf16.vlgmr.msra.gmra.mxu0 %v82_v13 }
  0x56   :  { %548 = vmatprep.mubr.msk.bf16.mxu0 %vm704_vm0, %v703_v0  ;;  %533 = vmatpush3.bf16.msra.mxu0 %v577_v19 }
  0x57   :  { %534 = vmatprep.subr.bf16.mxu0 %v703_v0 }
  0x5a   :  { %535 = vmatpush3.bf16.msra.mxu0 %v578_v20 }
  0x5b   :  { %536 = vmatprep.subr.bf16.mxu0 %v703_v0 }
  0x5e   :  { %537 = vmatpush3.bf16.msra.mxu0 %v579_v21 }
  0x5f   :  { %538 = vmatprep.subr.bf16.mxu0 %v703_v0 }
  0x62   :  { %539 = vmatpush3.bf16.msra.mxu0 %v580_v30 }
  0x63   :  { %540 = vmatprep.subr.bf16.mxu0 %v703_v0 }
  0x66   :  { %541 = vmatpush3.bf16.msra.mxu0 %v581_v31 }
  0x67   :  { %542 = vmatprep.subr.bf16.mxu0 %v703_v0 }
  0x6a   :  { %543 = vmatpush3.bf16.msra.mxu0 %v582_v32 }
  0x6b   :  { %544 = vmatprep.subr.bf16.mxu0 %v703_v0 }
  0x6e   :  { %545 = vmatpush3.bf16.msra.mxu0 %v583_v33 }
  0x6f   :  { %546 = vmatprep.subr.bf16.mxu0 %v703_v0 }
  0x72   :  { %547 = vmatpush3.bf16.msra.mxu0 %v584_v34 }
 0x115   :  { %v188_v23 = vpop.f32.mrf.mxu0 }
 0x116   :  { %v189_v24 = vadd.f32 %v438_v22, %v188_v23 }
 0x117   :  { %v510_v25 = vpop.f32.mrf.mxu0 }
 0x118   :  { %585 = vtanh.f32 %v189_v24 }
 0x119   :  { %v191_v26 = vpop.f32.mrf.mxu0 }
 0x11b   :  { %v511_v27 = vpop.f32.mrf.mxu0 }
 0x125   :  { %v586_v28 = vpop.eup %585 }
 0x126   :  { %v195_v29 = vpack.c.bf16 %v586_v28, %v586_v28 }
 0x128   :  { %529 = vmatmul.mubr.bf16.vlgmr.msra.gmra.mxu1 %v195_v29 }
 0x1e8   :  { %v301_v36 = vpop.f32.mrf.mxu1 }
 0x1e9   :  { %v302_v37 = vadd.f32 %v447_v35, %v301_v36 }
 0x1ea   :  { %v530_v38 = vpop.f32.mrf.mxu1 }
 0x1eb   :  { %587 = vtanh.f32 %v302_v37 }
 0x1ec   :  { %v304_v39 = vpop.f32.mrf.mxu1 }
 0x1ee   :  { %v531_v40 = vpop.f32.mrf.mxu1 }
 0x1f8   :  { %v588_v41 = vpop.eup %587 }
 0x1f9   :  { %v308_v42 = vpack.c.bf16 %v588_v41, %v588_v41 }
 0x1fb   :  { %549 = vmatmul.mubr.bf16.vlgmr.msra.gmra.mxu0 %v308_v42 }
 0x2bb   :  { %v414_v44 = vpop.f32.mrf.mxu0 }
 0x2bc   :  { %v415_v45 = vadd.f32 %v456_v43, %v414_v44 }
 0x2bd   :  { %v550_v46 = vpop.f32.mrf.mxu0 }
 0x2be   :  { %420 = vst [vmem:[#allocation10] sm:$0xff] %v415_v45 }
 0x2bf   :  { %v417_v47 = vpop.f32.mrf.mxu0 }
 0x2c0   :  { %680 = shalt.err (!%p677_p10)
}
 0x2c1   :  { %430 = dma.vmem_to_hbm [thread:$0]  %s428_s25, 128, %s816_s7, [#allocation4]   ;;  %v551_v48 = vpop.f32.mrf.mxu0 }
 0x2c2   :  { %695 = dma.done.wait [#allocation4], 128  }
 0x2c3   :  { %696 = vsyncadd [#allocation4], 4294967168 }
 0x2c4   :  { %434 = vsyncpa [#allocation3], 1 }
 0x2c5   :  { %435 = vsyncpa [#allocation6], 1 }
 0x2c6   :  { %436 = vsyncpa [#allocation9], 1 }
 0x2c7   :  { %437 = vsyncpa [#allocation4], 1 }

// kernel: _forward_impl.1
= control target key start
LH: loop header
LB: loop body
LE: loop exit
PB: predicated region body
PF: predicated region fallthrough
CT: control target
= control target key end

     0   :  { %12 = vsyncpa [#allocation3], 0  ;;  %s809_s0 = inlined_call_operand.hbm [shape: f32[8,128], index: 0, kind: input, shape index: {}]   ;;  %s810_s1 = inlined_call_operand.hbm [shape: bf16[128,128], index: 1, kind: input, shape index: {}]   ;;  %s811_s2 = inlined_call_operand.vmem [shape: f32[1,128], index: 2, kind: input, shape index: {}]   ;;  %s812_s3 = inlined_call_operand.hbm [shape: bf16[128,128], index: 3, kind: input, shape index: {}]   ;;  %s813_s4 = inlined_call_operand.vmem [shape: f32[1,128], index: 4, kind: input, shape index: {}]   ;;  %s814_s5 = inlined_call_operand.hbm [shape: bf16[128,128], index: 5, kind: input, shape index: {}]   ;;  %s815_s6 = inlined_call_operand.vmem [shape: f32[1,128], index: 6, kind: input, shape index: {}]   ;;  %s816_s7 = inlined_call_operand.hbm [shape: f32[8,128], index: 7, kind: output, shape index: {}]  }
   0x1   :  { %13 = vsyncpa [#allocation6], 0 }
   0x2   :  { %14 = vsyncpa [#allocation9], 0 }
   0x3   :  { %15 = vsyncpa [#allocation4], 0  ;;  %s697_s24 = smov [#allocation5]  }
   0x4   :  { %s31_s25 = sshll.u32 %s697_s24, 4  ;;  %s32_s25 = int_to_ptr.vmem [resolvable:$true] %s31_s25 }
   0x5   :  { %s597_s26 = scalar_lea.vmem %s32_s25, 1024  ;;  %p602_p1 = scmp.lt.s32.totalorder %s32_s25, %s32_s25 }
   0x6   :  { %p598_p0 = scmp.ne.s32.totalorder %s32_s25, %s597_s26  ;;  %p603_p2 = scmp.lt.s32.totalorder %s597_s26, %s597_s26 }
   0x8   :  { %p604_p3 = por %p603_p2, %p602_p1 }
   0xa   :  { %p605_p4 = pnand %p604_p3, %p598_p0 }
   0xc   :  { %608 = shalt.err (!%p605_p4)
}
   0xd   :  { %s698_s27 = smov 64   ;;  %s699_s28 = smov 4  }
   0xe   :  { %37 = dma.hbm_to_vmem [thread:$0]  %s810_s1, 1024, %s32_s25, [#allocation6], %s698_s27, %s698_s27, %s699_s28  }
   0xf   :  { %s700_s8 = smov [#allocation2]   ;;  %s701_s10 = smov [#allocation7]  }
  0x10   :  { %s22_s9 = sshll.u32 %s700_s8, 4  ;;  %s45_s11 = sshll.u32 %s701_s10, 4  ;;  %s23_s9 = int_to_ptr.vmem [resolvable:$true] %s22_s9  ;;  %s46_s11 = int_to_ptr.vmem [resolvable:$true] %s45_s11 }
  0x11   :  { %s617_s12 = scalar_lea.vmem %s23_s9, 128  ;;  %p622_p6 = scmp.lt.s32.totalorder %s23_s9, %s23_s9 }
  0x12   :  { %p618_p5 = scmp.ne.s32.totalorder %s23_s9, %s617_s12  ;;  %p623_p7 = scmp.lt.s32.totalorder %s617_s12, %s617_s12 }
  0x14   :  { %p624_p8 = por %p623_p7, %p622_p6 }
  0x16   :  { %p625_p9 = pnand %p624_p8, %p618_p5 }
  0x18   :  { %628 = shalt.err (!%p625_p9)
}
  0x19   :  { %25 = dma.hbm_to_vmem [thread:$0]  %s809_s0, 128, %s23_s9, [#allocation3]  }
  0x1a   :  { %s637_s15 = scalar_lea.vmem %s46_s11, 1024  ;;  %p642_p11 = scmp.lt.s32.totalorder %s46_s11, %s46_s11 }
  0x1b   :  { %p638_p10 = scmp.ne.s32.totalorder %s46_s11, %s637_s15  ;;  %p643_p12 = scmp.lt.s32.totalorder %s637_s15, %s637_s15 }
  0x1d   :  { %p644_p13 = por %p643_p12, %p642_p11 }
  0x1f   :  { %p645_p0 = pnand %p644_p13, %p638_p10 }
  0x21   :  { %648 = shalt.err (!%p645_p0)
}
  0x22   :  { %51 = dma.hbm_to_vmem [thread:$0]  %s812_s3, 1024, %s46_s11, [#allocation6], %s698_s27, %s698_s27, %s699_s28  }
  0x23   :  { %s702_s17 = smov [#allocation8]  }
  0x24   :  { %s59_s18 = sshll.u32 %s702_s17, 4  ;;  %s60_s18 = int_to_ptr.vmem [resolvable:$true] %s59_s18 }
  0x25   :  { %s657_s19 = scalar_lea.vmem %s60_s18, 1024  ;;  %p662_p2 = scmp.lt.s32.totalorder %s60_s18, %s60_s18 }
  0x26   :  { %p658_p1 = scmp.ne.s32.totalorder %s60_s18, %s657_s19  ;;  %p663_p3 = scmp.lt.s32.totalorder %s657_s19, %s657_s19 }
  0x28   :  { %p664_p4 = por %p663_p3, %p662_p2 }
  0x2a   :  { %p665_p5 = pnand %p664_p4, %p658_p1 }
  0x2c   :  { %668 = shalt.err (!%p665_p5)
}
  0x2d   :  { %65 = dma.hbm_to_vmem [thread:$0]  %s814_s5, 1024, %s60_s18, [#allocation9], %s698_s27, %s698_s27, %s699_s28  }
  0x2e   :  { %689 = dma.done.wait [#allocation3], 128  }
  0x2f   :  { %690 = vsyncadd [#allocation3], 4294967168 }
  0x30   :  { %691 = dma.done.wait [#allocation6], 2048  }
  0x31   :  { %692 = vsyncadd [#allocation6], 4294965248 }
  0x32   :  { %693 = dma.done.wait [#allocation9], 1024  }
  0x33   :  { %694 = vsyncadd [#allocation9], 4294966272  ;;  %v703_v0 = vmov 0.0   ;;  %vm704_vm0 = vmmov 0   ;;  %v561_v1 = vld [vmem:[#allocation5 + $0x38] sm:$0xff]   ;;  %v562_v2 = vld [vmem:[#allocation5 + $0x30] sm:$0xff]  }
  0x34   :  { %492 = vmatprep.subr.bf16.mxu0 %v703_v0  ;;  %508 = vmatprep.mubr.msk.bf16.mxu0 %vm704_vm0, %v703_v0  ;;  %v563_v3 = vld [vmem:[#allocation5 + $0x28] sm:$0xff]   ;;  %v569_v4 = vld [vmem:[#allocation7 + $0x38] sm:$0xff]   ;;  %v564_v5 = vld [vmem:[#allocation5 + $0x20] sm:$0xff]   ;;  %s705_s24 = smov [#allocation10]  }
  0x35   :  { %512 = vmatprep.subr.bf16.mxu1 %v703_v0  ;;  %528 = vmatprep.mubr.msk.bf16.mxu1 %vm704_vm0, %v703_v0  ;;  %v570_v6 = vld [vmem:[#allocation7 + $0x30] sm:$0xff]   ;;  %v565_v7 = vld [vmem:[#allocation5 + $0x18] sm:$0xff]   ;;  %v571_v8 = vld [vmem:[#allocation7 + $0x28] sm:$0xff]   ;;  %s427_s25 = sshll.u32 %s705_s24, 4  ;;  %s428_s25 = int_to_ptr.vmem [resolvable:$true] %s427_s25 }
  0x36   :  { %493 = vmatpush3.bf16.msra.mxu0 %v561_v1  ;;  %513 = vmatpush3.bf16.msra.mxu1 %v569_v4  ;;  %v566_v9 = vld [vmem:[#allocation5 + $0x10] sm:$0xff]   ;;  %v567_v10 = vld [vmem:[#allocation5 + $0x8] sm:$0xff]   ;;  %v568_v11 = vld [vmem:[#allocation5] sm:$0xff]   ;;  %p674_p7 = scmp.lt.s32.totalorder %s428_s25, %s428_s25 }
  0x37   :  { %494 = vmatprep.subr.bf16.mxu0 %v703_v0  ;;  %514 = vmatprep.subr.bf16.mxu1 %v703_v0  ;;  %v81_v12 = vld [vmem:[#allocation2] sm:$0xff]  ;;  %v572_v14 = vld [vmem:[#allocation7 + $0x20] sm:$0xff]   ;;  %v574_v16 = vld [vmem:[#allocation7 + $0x10] sm:$0xff]  }
  0x38   :  { %v82_v13 = vpack.c.bf16 %v81_v12, %v81_v12  ;;  %v573_v15 = vld [vmem:[#allocation7 + $0x18] sm:$0xff]   ;;  %v575_v17 = vld [vmem:[#allocation7 + $0x8] sm:$0xff]   ;;  %v576_v18 = vld [vmem:[#allocation7] sm:$0xff]  }
  0x39   :  { %v577_v19 = vld [vmem:[#allocation8 + $0x38] sm:$0xff]   ;;  %v578_v20 = vld [vmem:[#allocation8 + $0x30] sm:$0xff]   ;;  %v579_v21 = vld [vmem:[#allocation8 + $0x28] sm:$0xff]  }
  0x3a   :  { %495 = vmatpush3.bf16.msra.mxu0 %v562_v2  ;;  %515 = vmatpush3.bf16.msra.mxu1 %v570_v6  ;;  %v438_v22 = vld [vmem:[%s811_s2] ss:$0 sm:$0xff]  ;;  %v580_v30 = vld [vmem:[#allocation8 + $0x20] sm:$0xff]   ;;  %v582_v32 = vld [vmem:[#allocation8 + $0x10] sm:$0xff]  }
  0x3b   :  { %496 = vmatprep.subr.bf16.mxu0 %v703_v0  ;;  %516 = vmatprep.subr.bf16.mxu1 %v703_v0  ;;  %v581_v31 = vld [vmem:[#allocation8 + $0x18] sm:$0xff]   ;;  %v583_v33 = vld [vmem:[#allocation8 + $0x8] sm:$0xff]   ;;  %v584_v34 = vld [vmem:[#allocation8] sm:$0xff]  }
  0x3c   :  { %v447_v35 = vld [vmem:[%s813_s4] ss:$0 sm:$0xff]  ;;  %s669_s4 = scalar_lea.vmem %s428_s25, 128 }
  0x3d   :  { %v456_v43 = vld [vmem:[%s815_s6] ss:$0 sm:$0xff]  ;;  %p670_p6 = scmp.ne.s32.totalorder %s428_s25, %s669_s4  ;;  %p675_p8 = scmp.lt.s32.totalorder %s669_s4, %s669_s4 }
  0x3e   :  { %497 = vmatpush3.bf16.msra.mxu0 %v563_v3  ;;  %517 = vmatpush3.bf16.msra.mxu1 %v571_v8 }
  0x3f   :  { %498 = vmatprep.subr.bf16.mxu0 %v703_v0  ;;  %518 = vmatprep.subr.bf16.mxu1 %v703_v0  ;;  %p676_p9 = por %p675_p8, %p674_p7 }
  0x41   :  { %p677_p10 = pnand %p676_p9, %p670_p6 }
  0x42   :  { %499 = vmatpush3.bf16.msra.mxu0 %v564_v5  ;;  %519 = vmatpush3.bf16.msra.mxu1 %v572_v14 }
  0x43   :  { %500 = vmatprep.subr.bf16.mxu0 %v703_v0  ;;  %520 = vmatprep.subr.bf16.mxu1 %v703_v0 }
  0x46   :  { %501 = vmatpush3.bf16.msra.mxu0 %v565_v7  ;;  %521 = vmatpush3.bf16.msra.mxu1 %v573_v15 }
  0x47   :  { %502 = vmatprep.subr.bf16.mxu0 %v703_v0  ;;  %522 = vmatprep.subr.bf16.mxu1 %v703_v0 }
  0x4a   :  { %503 = vmatpush3.bf16.msra.mxu0 %v566_v9  ;;  %523 = vmatpush3.bf16.msra.mxu1 %v574_v16 }
  0x4b   :  { %504 = vmatprep.subr.bf16.mxu0 %v703_v0  ;;  %524 = vmatprep.subr.bf16.mxu1 %v703_v0 }
  0x4e   :  { %505 = vmatpush3.bf16.msra.mxu0 %v567_v10  ;;  %525 = vmatpush3.bf16.msra.mxu1 %v575_v17 }
  0x4f   :  { %506 = vmatprep.subr.bf16.mxu0 %v703_v0  ;;  %526 = vmatprep.subr.bf16.mxu1 %v703_v0 }
  0x52   :  { %507 = vmatpush3.bf16.msra.mxu0 %v568_v11  ;;  %527 = vmatpush3.bf16.msra.mxu1 %v576_v18 }
  0x53   :  { %532 = vmatprep.subr.bf16.mxu0 %v703_v0 }
  0x55   :  { %509 = vmatmul.mubr.bf16.vlgmr.msra.gmra.mxu0 %v82_v13 }
  0x56   :  { %548 = vmatprep.mubr.msk.bf16.mxu0 %vm704_vm0, %v703_v0  ;;  %533 = vmatpush3.bf16.msra.mxu0 %v577_v19 }
  0x57   :  { %534 = vmatprep.subr.bf16.mxu0 %v703_v0 }
  0x5a   :  { %535 = vmatpush3.bf16.msra.mxu0 %v578_v20 }
  0x5b   :  { %536 = vmatprep.subr.bf16.mxu0 %v703_v0 }
  0x5e   :  { %537 = vmatpush3.bf16.msra.mxu0 %v579_v21 }
  0x5f   :  { %538 = vmatprep.subr.bf16.mxu0 %v703_v0 }
  0x62   :  { %539 = vmatpush3.bf16.msra.mxu0 %v580_v30 }
  0x63   :  { %540 = vmatprep.subr.bf16.mxu0 %v703_v0 }
  0x66   :  { %541 = vmatpush3.bf16.msra.mxu0 %v581_v31 }
  0x67   :  { %542 = vmatprep.subr.bf16.mxu0 %v703_v0 }
  0x6a   :  { %543 = vmatpush3.bf16.msra.mxu0 %v582_v32 }
  0x6b   :  { %544 = vmatprep.subr.bf16.mxu0 %v703_v0 }
  0x6e   :  { %545 = vmatpush3.bf16.msra.mxu0 %v583_v33 }
  0x6f   :  { %546 = vmatprep.subr.bf16.mxu0 %v703_v0 }
  0x72   :  { %547 = vmatpush3.bf16.msra.mxu0 %v584_v34 }
 0x115   :  { %v188_v23 = vpop.f32.mrf.mxu0 }
 0x116   :  { %v189_v24 = vadd.f32 %v438_v22, %v188_v23 }
 0x117   :  { %v510_v25 = vpop.f32.mrf.mxu0 }
 0x118   :  { %585 = vtanh.f32 %v189_v24 }
 0x119   :  { %v191_v26 = vpop.f32.mrf.mxu0 }
 0x11b   :  { %v511_v27 = vpop.f32.mrf.mxu0 }
 0x125   :  { %v586_v28 = vpop.eup %585 }
 0x126   :  { %v195_v29 = vpack.c.bf16 %v586_v28, %v586_v28 }
 0x128   :  { %529 = vmatmul.mubr.bf16.vlgmr.msra.gmra.mxu1 %v195_v29 }
 0x1e8   :  { %v301_v36 = vpop.f32.mrf.mxu1 }
 0x1e9   :  { %v302_v37 = vadd.f32 %v447_v35, %v301_v36 }
 0x1ea   :  { %v530_v38 = vpop.f32.mrf.mxu1 }
 0x1eb   :  { %587 = vtanh.f32 %v302_v37 }
 0x1ec   :  { %v304_v39 = vpop.f32.mrf.mxu1 }
 0x1ee   :  { %v531_v40 = vpop.f32.mrf.mxu1 }
 0x1f8   :  { %v588_v41 = vpop.eup %587 }
 0x1f9   :  { %v308_v42 = vpack.c.bf16 %v588_v41, %v588_v41 }
 0x1fb   :  { %549 = vmatmul.mubr.bf16.vlgmr.msra.gmra.mxu0 %v308_v42 }
 0x2bb   :  { %v414_v44 = vpop.f32.mrf.mxu0 }
 0x2bc   :  { %v415_v45 = vadd.f32 %v456_v43, %v414_v44 }
 0x2bd   :  { %v550_v46 = vpop.f32.mrf.mxu0 }
 0x2be   :  { %420 = vst [vmem:[#allocation10] sm:$0xff] %v415_v45 }
 0x2bf   :  { %v417_v47 = vpop.f32.mrf.mxu0 }
 0x2c0   :  { %680 = shalt.err (!%p677_p10)
}
 0x2c1   :  { %430 = dma.vmem_to_hbm [thread:$0]  %s428_s25, 128, %s816_s7, [#allocation4]   ;;  %v551_v48 = vpop.f32.mrf.mxu0 }
 0x2c2   :  { %695 = dma.done.wait [#allocation4], 128  }
 0x2c3   :  { %696 = vsyncadd [#allocation4], 4294967168 }
 0x2c4   :  { %434 = vsyncpa [#allocation3], 1 }
 0x2c5   :  { %435 = vsyncpa [#allocation6], 1 }
 0x2c6   :  { %436 = vsyncpa [#allocation9], 1 }
 0x2c7   :  { %437 = vsyncpa [#allocation4], 1 }

</bundles_post_ra>
